<compile_context>
chip_gen: v7x
topology: tpu7x:2x2x1
jax: 0.10.0
libtpu: 0.0.40
codegen_flags: <defaults>
</compile_context>

<pallas_src>
import jax
import jax.numpy as jnp
from jax.experimental import pallas as pl
from jax.experimental.pallas import tpu as pltpu


def _copy_kernel(x_ref, o_ref):
    # One (TM, TN) lane-dense tile of the flat (N, C*H*W) array: straight copy.
    o_ref[...] = x_ref[...]


def _pick_lane_tile(full, max_tile=8192):
    """Largest multiple of 128 that evenly divides `full` and is <= max_tile.
    Falls back to the full extent (always a legal BlockSpec block)."""
    if full % 128 != 0 or full < 128:
        return full
    t = min(full, max_tile)
    t -= t % 128
    while t >= 128:
        if full % t == 0:
            return t
        t -= 128
    return full


def _pick_sublane_tile(full, align, max_tile=256):
    """Largest multiple of `align` that evenly divides `full` and is <= max_tile.
    Falls back to the full extent."""
    if full % align != 0 or full < align:
        return full
    t = min(full, max_tile)
    t -= t % align
    while t >= align:
        if full % t == 0:
            return t
        t -= align
    return full


def unflatten(x, C=128, H=7, W=7):
    """Pallas equivalent of Unflatten.forward: (N, C*H*W) -> (N, C, H, W)."""
    N = x.shape[0]
    F = C * H * W
    assert x.shape[1] == F, "input second dim must equal C*H*W"

    itemsize = jnp.dtype(x.dtype).itemsize
    sublane = {4: 8, 2: 16, 1: 32}.get(itemsize, 8)

    # Lane (last) dim: big multiple-of-128 tile for unmasked vst + long DMA rows.
    tn = _pick_lane_tile(F)
    # VMEM budget: 2 specs x 2 buffers = 4 * tile_bytes; keep tile <= 4 MiB so
    # total stays well under the default scoped limit on every generation
    # (including v7x's 64 MiB physical VMEM).
    budget_elems = (4 * 1024 * 1024) // itemsize
    max_tm = max(sublane, budget_elems // max(tn, 1))
    tm = _pick_sublane_tile(N, sublane, max_tile=min(256, max_tm))

    grid = (N // tm, F // tn)

    flat = pl.pallas_call(
        _copy_kernel,
        out_shape=jax.ShapeDtypeStruct((N, F), x.dtype),
        grid=grid,
        in_specs=[pl.BlockSpec((tm, tn), lambda i, j: (i, j))],
        out_specs=pl.BlockSpec((tm, tn), lambda i, j: (i, j)),
        compiler_params=pltpu.CompilerParams(
            # Both axes independent -> shards across the 2 TCs on v7x; no-op on
            # v5e/v6e.
            dimension_semantics=("parallel", "parallel"),
        ),
    )(x)

    # Contiguous reshape is a zero-cost view in XLA (same semantics as .view).
    return flat.reshape(N, C, H, W)


if __name__ == "__main__":
    key = jax.random.PRNGKey(0)
    k1, k2 = jax.random.split(key)

    # Small, lane-aligned case (N=2, C=4, H=8, W=16 -> flat dim 512).
    N, C, H, W = 2, 4, 8, 16
    x = jax.random.normal(k1, (N, C * H * W), dtype=jnp.float32)
    y = unflatten(x, C=C, H=H, W=W)
    jax.block_until_ready(y)
    assert y.shape == (N, C, H, W)
    assert y.dtype == x.dtype
    assert jnp.array_equal(y, x.reshape(N, C, H, W))

    # Module default channel/spatial shapes (C=128, H=7, W=7), small batch.
    # Flat dim 6272 = 49*128 is lane-aligned; the flat tiling handles it with
    # no masked loads/stores.
    N2 = 2
    x2 = jax.random.normal(k2, (N2, 128 * 7 * 7), dtype=jnp.float32)
    y2 = unflatten(x2)  # defaults C=128, H=7, W=7
    jax.block_until_ready(y2)
    assert y2.shape == (N2, 128, 7, 7)
    assert jnp.array_equal(y2, x2.reshape(N2, 128, 7, 7))

    print("KERNEL_OK")
</pallas_src>

<mosaic_0001>
module attributes {stable_mosaic.version = 11 : i64} {
  func.func @_copy_kernel(%arg0: i32, %arg1: i32, %arg2: memref<2x512xf32, #tpu.memory_space<vmem>>, %arg3: memref<2x512xf32, #tpu.memory_space<vmem>>) attributes {dimension_semantics = [#tpu.dimension_semantics<parallel>, #tpu.dimension_semantics<parallel>], iteration_bounds = array<i64: 1, 1>, scalar_prefetch = 0 : i64, scratch_operands = 0 : i64, tpu.core_type = #tpu.core_type<tc>, window_params = [{transform_indices = @transform_0, window_bounds = array<i64: 2, 512>}, {transform_indices = @transform_1, window_bounds = array<i64: 2, 512>}]} {
    %c0 = arith.constant 0 : index
    %c0_0 = arith.constant 0 : index
    %0 = vector.load %arg2[%c0, %c0_0] : memref<2x512xf32, #tpu.memory_space<vmem>>, vector<2x512xf32>
    %c0_1 = arith.constant 0 : index
    %c0_2 = arith.constant 0 : index
    %1 = vector.load %arg3[%c0_1, %c0_2] : memref<2x512xf32, #tpu.memory_space<vmem>>, vector<2x512xf32>
    tpu.vector_store %arg3[%c0_1, %c0_2], %0 {strides = array<i32>} : memref<2x512xf32, #tpu.memory_space<vmem>>, vector<2x512xf32>,
    return
  }
  func.func @transform_0(%arg0: i32, %arg1: i32) -> (i32, i32) {
    %c0_i32 = arith.constant 0 : i32
    return %arg0, %arg1 : i32, i32
  }
  func.func @transform_1(%arg0: i32, %arg1: i32) -> (i32, i32) {
    %c0_i32 = arith.constant 0 : i32
    return %arg0, %arg1 : i32, i32
  }
}

</mosaic_0001>

<bundles_post_ra>
// kernel: tpu_custom_call.1
= control target key start
LH: loop header
LB: loop body
LE: loop exit
PB: predicated region body
PF: predicated region fallthrough
CT: control target
= control target key end

     0   :  { %6 = vsyncpa [#allocation3], 0  ;;  %s124_s0 = inlined_call_operand.hbm [shape: f32[2,512], index: 0, kind: input, shape index: {}]   ;;  %s125_s1 = inlined_call_operand.hbm [shape: f32[2,512], index: 1, kind: output, shape index: {}]  }
   0x1   :  { %7 = vsyncpa [#allocation4], 0  ;;  %s88_s6 = smov [#allocation2]   ;;  %s40_s10 = scalar_lea.hbm %s124_s0, 128 }
   0x2   :  { %s14_s7 = sshll.u32 %s88_s6, 4  ;;  %p41_p0 = scmp.ne.s32.totalorder %s124_s0, %s40_s10  ;;  %s15_s7 = int_to_ptr.vmem [resolvable:$true] %s14_s7 }
   0x3   :  { %p44_p1 = scmp.lt.u32.totalorder %s40_s10, %s124_s0 }
   0x5   :  { %p46_p2 = pnand %p44_p1, %p41_p0 }
   0x7   :  { %49 = shalt.err (!%p46_p2)
}
   0x8   :  { %s50_s15 = scalar_lea.vmem %s15_s7, 128  ;;  %p55_p4 = scmp.lt.s32.totalorder %s15_s7, %s15_s7 }
   0x9   :  { %p51_p3 = scmp.ne.s32.totalorder %s15_s7, %s50_s15  ;;  %p56_p5 = scmp.lt.s32.totalorder %s50_s15, %s50_s15 }
   0xb   :  { %p57_p6 = por %p56_p5, %p55_p4 }
   0xd   :  { %p58_p7 = pnand %p57_p6, %p51_p3 }
   0xf   :  { %61 = shalt.err (!%p58_p7)
}
  0x10   :  { %17 = dma.hbm_to_vmem [thread:$0]  %s124_s0, 128, %s15_s7, [#allocation3]  }
  0x11   :  { %84 = dma.done.wait [#allocation3], 128  }
  0x12   :  { %85 = vsyncadd [#allocation3], 4294967168  ;;  %s89_s18 = smov [#allocation5]   ;;  %v21_v0 = vld [vmem:[#allocation2] sm:$0xff] }
  0x13   :  { %s29_s19 = sshll.u32 %s89_s18, 4  ;;  %22 = vst [vmem:[#allocation5] sm:$0xff] %v21_v0  ;;  %s30_s19 = int_to_ptr.vmem [resolvable:$true] %s29_s19 }
  0x14   :  { %s62_s20 = scalar_lea.vmem %s30_s19, 128  ;;  %p67_p9 = scmp.lt.s32.totalorder %s30_s19, %s30_s19 }
  0x15   :  { %p63_p8 = scmp.ne.s32.totalorder %s30_s19, %s62_s20  ;;  %p68_p10 = scmp.lt.s32.totalorder %s62_s20, %s62_s20 }
  0x17   :  { %p69_p11 = por %p68_p10, %p67_p9 }
  0x19   :  { %p70_p12 = pnand %p69_p11, %p63_p8 }
  0x1b   :  { %73 = shalt.err (!%p70_p12)
}
  0x1c   :  { %s74_s23 = scalar_lea.hbm %s125_s1, 128 }
  0x1d   :  { %p75_p13 = scmp.ne.s32.totalorder %s125_s1, %s74_s23  ;;  %p78_p0 = scmp.lt.u32.totalorder %s74_s23, %s125_s1 }
  0x1f   :  { %p80_p1 = pnand %p78_p0, %p75_p13 }
  0x21   :  { %83 = shalt.err (!%p80_p1)
}
  0x22   :  { %32 = dma.vmem_to_hbm [thread:$0]  %s30_s19, 128, %s125_s1, [#allocation4]  }
  0x23   :  { %86 = dma.done.wait [#allocation4], 128  }
  0x24   :  { %87 = vsyncadd [#allocation4], 4294967168 }
  0x25   :  { %36 = vsyncpa [#allocation3], 1 }
  0x26   :  { %37 = vsyncpa [#allocation4], 1 }

</bundles_post_ra>
